<compile_context>
chip_gen: v7x
topology: tpu7x:2x2x1
jax: 0.10.0
libtpu: 0.0.40
codegen_flags: <defaults>
</compile_context>

<pallas_src>
import numpy as np

import jax
import jax.numpy as jnp
from jax.experimental import pallas as pl
from jax.experimental.pallas import tpu as pltpu

_MXU_DTYPE = jnp.bfloat16     # MXU operand dtype (accumulation stays f32)
_NEG_SLOPE = 0.01             # PyTorch LeakyReLU default
_BN_EPS = 1e-5


# ----------------------------------------------------------------------------
# Fused kernel: one grid step processes Nb images.
# ----------------------------------------------------------------------------
def _down_conv_kernel(x_ref, t1_ref, t2_ref, b1_ref, b2_ref, o_ref,
                      xp1_ref, xp2_ref):
    Nb = x_ref.shape[0]
    Ho = x_ref.shape[2]
    Hp = Ho + 2                       # per-image padded row block
    M = Nb * Hp - 2                   # matmul M (image-boundary rows discarded)
    mxu = t1_ref.dtype

    # Zero only the H-padding rows (interior rows are fully overwritten below).
    # 4*Nb single-row, full-lane-width stores -- negligible, and safe under any
    # core/grid split (no reliance on program_id==0 initialisation).
    z1 = jnp.zeros((1, xp1_ref.shape[1]), xp1_ref.dtype)
    z2 = jnp.zeros((1, xp2_ref.shape[1]), xp2_ref.dtype)
    for b in range(Nb):               # Nb is small by construction
        xp1_ref[pl.ds(b * Hp, 1), :] = z1
        xp1_ref[pl.ds(b * Hp + Ho + 1, 1), :] = z1
        xp2_ref[pl.ds(b * Hp, 1), :] = z2
        xp2_ref[pl.ds(b * Hp + Ho + 1, 1), :] = z2

    # MaxPool2d(2): the wrapper delivers the 4 pooling parities as separate
    # slabs, so the pool is 3 dense VPU maxima per image and the result is
    # already channel-major, decimated and lane-dense: (Ho, Cin*Wo).
    for b in range(Nb):
        pm = jnp.maximum(jnp.maximum(x_ref[b, 0], x_ref[b, 1]),
                         jnp.maximum(x_ref[b, 2], x_ref[b, 3]))
        xp1_ref[pl.ds(b * Hp + 1, Ho), :] = pm.astype(xp1_ref.dtype)

    # conv1 (+ BN scale folded into t1): 3 fat-K block-Toeplitz MXU matmuls,
    # bf16 operands, f32 accumulation, acc initialised from the first dot.
    acc1 = jnp.dot(xp1_ref[pl.ds(0, M), :].astype(mxu), t1_ref[0],
                   preferred_element_type=jnp.float32)
    acc1 += jnp.dot(xp1_ref[pl.ds(1, M), :].astype(mxu), t1_ref[1],
                    preferred_element_type=jnp.float32)
    acc1 += jnp.dot(xp1_ref[pl.ds(2, M), :].astype(mxu), t1_ref[2],
                    preferred_element_type=jnp.float32)
    y1 = acc1 + b1_ref[...]
    y1 = jnp.where(y1 >= 0.0, y1, _NEG_SLOPE * y1)        # x1 (f32, stays on-chip)

    # conv2 input: interior rows only (pad rows stay zero).
    for b in range(Nb):
        xp2_ref[pl.ds(b * Hp + 1, Ho), :] = \
            y1[b * Hp:b * Hp + Ho, :].astype(xp2_ref.dtype)

    # conv2 (+ folded BN scale) + bias + LeakyReLU + residual (x1 reused from VMEM).
    acc2 = jnp.dot(xp2_ref[pl.ds(0, M), :].astype(mxu), t2_ref[0],
                   preferred_element_type=jnp.float32)
    acc2 += jnp.dot(xp2_ref[pl.ds(1, M), :].astype(mxu), t2_ref[1],
                    preferred_element_type=jnp.float32)
    acc2 += jnp.dot(xp2_ref[pl.ds(2, M), :].astype(mxu), t2_ref[2],
                    preferred_element_type=jnp.float32)
    y2 = acc2 + b2_ref[...]
    y2 = jnp.where(y2 >= 0.0, y2, _NEG_SLOPE * y2) + y1

    # Lane-dense channel-major output: one full-width store per image.
    for b in range(Nb):
        o_ref[b, :, :] = y2[b * Hp:b * Hp + Ho, :].astype(o_ref.dtype)


# ----------------------------------------------------------------------------
# Wrapper: one pallas_call for the whole down_conv forward (NCHW in/out).
# ----------------------------------------------------------------------------
def _pick_nb(N, Ho):
    """Images per grid step: grow matmul M toward >=128 rows, but keep the grid
    length >= 2 when possible (v7x has 2 TensorCores)."""
    nb = min(N, max(1, -(-128 // Ho)))
    while nb > 1 and N // nb < 2:
        nb -= 1
    while N % nb:
        nb -= 1
    return nb


@jax.jit
def down_conv_forward(x_nchw, params):
    N, Cin, H, W = x_nchw.shape
    assert H % 2 == 0 and W % 2 == 0, "MaxPool2d(2) path assumes even H, W"
    Ho, Wo = H // 2, W // 2
    Hp = Ho + 2
    t1, t2, b1, b2 = params["t1"], params["t2"], params["b1"], params["b2"]
    K1 = t1.shape[1]              # Cin * Wo
    K2 = t1.shape[2]              # Cout * Wo
    Cout = K2 // Wo
    Nb = _pick_nb(N, Ho)

    # Wrapper-side relayout: expose the 4 MaxPool parities as a leading axis so
    # pooled rows are channel-major / lane-dense inside the kernel.
    # xr[n, 2*ph+pw, i, c*Wo+j] = x[n, c, 2i+ph, 2j+pw]
    xr = x_nchw.reshape(N, Cin, Ho, 2, Wo, 2)
    xr = jnp.transpose(xr, (0, 3, 5, 2, 1, 4)).reshape(N, 4, Ho, Cin * Wo)

    # VMEM budget hint: weight slabs + biases + scratches + double-buffered I/O.
    itb = np.dtype(_MXU_DTYPE).itemsize
    est = int((np.prod(t1.shape) + np.prod(t2.shape)) * itb
              + (np.prod(b1.shape) + np.prod(b2.shape)) * 4
              + Nb * Hp * (K1 + K2) * 4
              + 2 * Nb * (4 * Ho * K1 + Ho * K2) * 4)
    vmem_limit = int(max(32 << 20, min(112 << 20, 2 * est)))

    out = pl.pallas_call(
        _down_conv_kernel,
        out_shape=jax.ShapeDtypeStruct((N, Ho, K2), x_nchw.dtype),
        grid=(N // Nb,),
        in_specs=[
            pl.BlockSpec((Nb, 4, Ho, K1), lambda n: (n, 0, 0, 0)),
            pl.BlockSpec(t1.shape, lambda n: (0, 0, 0)),
            pl.BlockSpec(t2.shape, lambda n: (0, 0, 0)),
            pl.BlockSpec(b1.shape, lambda n: (0, 0)),
            pl.BlockSpec(b2.shape, lambda n: (0, 0)),
        ],
        out_specs=pl.BlockSpec((Nb, Ho, K2), lambda n: (n, 0, 0)),
        scratch_shapes=[
            pltpu.VMEM((Nb * Hp, K1), jnp.float32),   # padded pooled rows
            pltpu.VMEM((Nb * Hp, K2), jnp.float32),   # padded x1 rows
        ],
        compiler_params=pltpu.CompilerParams(
            dimension_semantics=("parallel",),
            vmem_limit_bytes=vmem_limit),
    )(xr, t1, t2, b1, b2)

    # Channel-major slab -> NCHW (cheap wrapper relayout, fusable downstream).
    return jnp.transpose(out.reshape(N, Ho, Cout, Wo), (0, 2, 1, 3))


# ----------------------------------------------------------------------------
# Weight / BN preprocessing (runs once, outside the kernel).
# ----------------------------------------------------------------------------
def fold_bn(gamma, beta, mean, var, conv_bias, eps=_BN_EPS):
    gamma, beta = np.asarray(gamma, np.float32), np.asarray(beta, np.float32)
    mean, var = np.asarray(mean, np.float32), np.asarray(var, np.float32)
    conv_bias = np.asarray(conv_bias, np.float32)
    scale = gamma / np.sqrt(var + eps)
    bias = beta + (conv_bias - mean) * scale
    return scale.astype(np.float32), bias.astype(np.float32)


def _toeplitz_weights(w, scale, Wo, dtype):
    """(3,3,Cin,Cout) HWIO kernel (with per-Cout BN scale folded in) -> 3
    block-Toeplitz slabs (Cin*Wo, Cout*Wo) so a 'same' 3x3 conv over
    channel-major rows becomes 3 fat-K matmuls.  Out-of-range W taps are
    dropped (zero columns); H padding is handled by zero scratch rows."""
    w = np.asarray(w, np.float32) * np.asarray(scale, np.float32)[None, None, None, :]
    _, _, cin, cout = w.shape
    t = np.zeros((3, cin * Wo, cout * Wo), np.float32)
    for dy in range(3):
        for dx in range(3):
            for j in range(Wo):
                jp = j + dx - 1
                if jp < 0 or jp >= Wo:
                    continue
                for ci in range(cin):
                    t[dy, ci * Wo + jp, j::Wo] = w[dy, dx, ci, :]
    return jnp.asarray(t, dtype)


def prepare_params(w1, s1, b1, w2, s2, b2, Wo, mxu_dtype=_MXU_DTYPE):
    rep = lambda v: jnp.asarray(np.repeat(np.asarray(v, np.float32), Wo)[None, :])
    return {
        "t1": _toeplitz_weights(w1, s1, Wo, mxu_dtype),
        "t2": _toeplitz_weights(w2, s2, Wo, mxu_dtype),
        "b1": rep(b1), "b2": rep(b2),
    }


# ----------------------------------------------------------------------------
# Pure-numpy reference (inference-mode PyTorch semantics, f32).
# ----------------------------------------------------------------------------
def _np_reference(x, w1, s1, b1, w2, s2, b2):
    N, Cin, H, W = x.shape
    Ho, Wo = H // 2, W // 2
    p = x.reshape(N, Cin, Ho, 2, Wo, 2).max(axis=(3, 5))

    def conv3(a, w):
        n, ci, h, wd = a.shape
        co = w.shape[-1]
        ap = np.zeros((n, ci, h + 2, wd + 2), np.float32)
        ap[:, :, 1:-1, 1:-1] = a
        out = np.zeros((n, co, h, wd), np.float32)
        for dy in range(3):
            for dx in range(3):
                out += np.einsum("ncij,co->noij",
                                 ap[:, :, dy:dy + h, dx:dx + wd], w[dy, dx])
        return out

    def lrelu(v):
        return np.where(v >= 0, v, _NEG_SLOPE * v)

    y1 = lrelu(conv3(p, w1) * s1[None, :, None, None] + b1[None, :, None, None])
    y2 = lrelu(conv3(y1, w2) * s2[None, :, None, None] + b2[None, :, None, None]) + y1
    return y2


if __name__ == "__main__":
    N, Cin, Cout, H, W = 2, 4, 8, 16, 16
    Ho, Wo = H // 2, W // 2
    key = jax.random.PRNGKey(0)
    ks = jax.random.split(key, 13)

    x_nchw = jax.random.normal(ks[0], (N, Cin, H, W), jnp.float32)

    # conv1: Conv2d(Cin, Cout, 3, pad=1) + BatchNorm2d(Cout)
    w1 = 0.1 * jax.random.normal(ks[1], (3, 3, Cin, Cout), jnp.float32)
    cb1 = 0.1 * jax.random.normal(ks[2], (Cout,), jnp.float32)
    g1 = 1.0 + 0.1 * jax.random.normal(ks[3], (Cout,), jnp.float32)
    be1 = 0.1 * jax.random.normal(ks[4], (Cout,), jnp.float32)
    m1 = 0.1 * jax.random.normal(ks[5], (Cout,), jnp.float32)
    v1 = 0.5 + jnp.abs(jax.random.normal(ks[6], (Cout,), jnp.float32))

    # conv2: Conv2d(Cout, Cout, 3, pad=1) + BatchNorm2d(Cout)
    w2 = 0.1 * jax.random.normal(ks[7], (3, 3, Cout, Cout), jnp.float32)
    cb2 = 0.1 * jax.random.normal(ks[8], (Cout,), jnp.float32)
    g2 = 1.0 + 0.1 * jax.random.normal(ks[9], (Cout,), jnp.float32)
    be2 = 0.1 * jax.random.normal(ks[10], (Cout,), jnp.float32)
    m2 = 0.1 * jax.random.normal(ks[11], (Cout,), jnp.float32)
    v2 = 0.5 + jnp.abs(jax.random.normal(ks[12], (Cout,), jnp.float32))

    s1v, b1v = fold_bn(g1, be1, m1, v1, cb1)
    s2v, b2v = fold_bn(g2, be2, m2, v2, cb2)
    params = prepare_params(w1, s1v, b1v, w2, s2v, b2v, Wo)

    out = jax.block_until_ready(down_conv_forward(x_nchw, params))
    assert out.shape == (N, Cout, Ho, Wo), out.shape

    # Tolerance accounts for bf16 MXU operands (weights + activation feeds);
    # all accumulation, bias, LeakyReLU and the residual stay in f32.
    ref = _np_reference(np.asarray(x_nchw), np.asarray(w1), s1v, b1v,
                        np.asarray(w2), s2v, b2v)
    np.testing.assert_allclose(np.asarray(out), ref, rtol=3e-2, atol=3e-2)
    print("KERNEL_OK")
</pallas_src>

<mosaic_0001>
module attributes {stable_mosaic.version = 11 : i64} {
  func.func @_down_conv_kernel(%arg0: i32, %arg1: memref<1x4x8x32xf32, #tpu.memory_space<vmem>>, %arg2: memref<3x32x64xbf16, #tpu.memory_space<vmem>>, %arg3: memref<3x64x64xbf16, #tpu.memory_space<vmem>>, %arg4: memref<1x64xf32, #tpu.memory_space<vmem>>, %arg5: memref<1x64xf32, #tpu.memory_space<vmem>>, %arg6: memref<1x8x64xf32, #tpu.memory_space<vmem>>, %arg7: memref<10x32xf32, #tpu.memory_space<vmem>>, %arg8: memref<10x64xf32, #tpu.memory_space<vmem>>) attributes {dimension_semantics = [#tpu.dimension_semantics<parallel>], iteration_bounds = array<i64: 2>, scalar_prefetch = 0 : i64, scratch_operands = 2 : i64, tpu.core_type = #tpu.core_type<tc>, window_params = [{transform_indices = @transform_0, window_bounds = array<i64: 1, 4, 8, 32>}, {pipeline_mode = #tpu.pipeline_mode<synchronous>, transform_indices = @transform_1, window_bounds = array<i64: 3, 32, 64>}, {pipeline_mode = #tpu.pipeline_mode<synchronous>, transform_indices = @transform_2, window_bounds = array<i64: 3, 64, 64>}, {pipeline_mode = #tpu.pipeline_mode<synchronous>, transform_indices = @transform_3, window_bounds = array<i64: 1, 64>}, {pipeline_mode = #tpu.pipeline_mode<synchronous>, transform_indices = @transform_4, window_bounds = array<i64: 1, 64>}, {transform_indices = @transform_5, window_bounds = array<i64: 1, 8, 64>}]} {
    %cst = arith.constant 0.000000e+00 : f32
    %0 = vector.broadcast %cst : f32 to vector<1x32xf32>
    %cst_0 = arith.constant 0.000000e+00 : f32
    %1 = vector.broadcast %cst_0 : f32 to vector<1x64xf32>
    %c0 = arith.constant 0 : index
    %c0_1 = arith.constant 0 : index
    %2 = vector.load %arg7[%c0, %c0_1] : memref<10x32xf32, #tpu.memory_space<vmem>>, vector<1x32xf32>
    tpu.vector_store %arg7[%c0, %c0_1], %0 {strides = array<i32>} : memref<10x32xf32, #tpu.memory_space<vmem>>, vector<1x32xf32>,
    %c9 = arith.constant 9 : index
    %c0_2 = arith.constant 0 : index
    %3 = vector.load %arg7[%c9, %c0_2] : memref<10x32xf32, #tpu.memory_space<vmem>>, vector<1x32xf32>
    tpu.vector_store %arg7[%c9, %c0_2], %0 {strides = array<i32>} : memref<10x32xf32, #tpu.memory_space<vmem>>, vector<1x32xf32>,
    %c0_3 = arith.constant 0 : index
    %c0_4 = arith.constant 0 : index
    %4 = vector.load %arg8[%c0_3, %c0_4] : memref<10x64xf32, #tpu.memory_space<vmem>>, vector<1x64xf32>
    tpu.vector_store %arg8[%c0_3, %c0_4], %1 {strides = array<i32>} : memref<10x64xf32, #tpu.memory_space<vmem>>, vector<1x64xf32>,
    %c9_5 = arith.constant 9 : index
    %c0_6 = arith.constant 0 : index
    %5 = vector.load %arg8[%c9_5, %c0_6] : memref<10x64xf32, #tpu.memory_space<vmem>>, vector<1x64xf32>
    tpu.vector_store %arg8[%c9_5, %c0_6], %1 {strides = array<i32>} : memref<10x64xf32, #tpu.memory_space<vmem>>, vector<1x64xf32>,
    %c0_7 = arith.constant 0 : index
    %c0_8 = arith.constant 0 : index
    %c0_9 = arith.constant 0 : index
    %c0_10 = arith.constant 0 : index
    %6 = vector.load %arg1[%c0_7, %c0_8, %c0_9, %c0_10] : memref<1x4x8x32xf32, #tpu.memory_space<vmem>>, vector<1x1x8x32xf32>
    %7 = vector.shape_cast %6 : vector<1x1x8x32xf32> to vector<8x32xf32>
    %c0_11 = arith.constant 0 : index
    %c1 = arith.constant 1 : index
    %c0_12 = arith.constant 0 : index
    %c0_13 = arith.constant 0 : index
    %8 = vector.load %arg1[%c0_11, %c1, %c0_12, %c0_13] : memref<1x4x8x32xf32, #tpu.memory_space<vmem>>, vector<1x1x8x32xf32>
    %9 = vector.shape_cast %8 : vector<1x1x8x32xf32> to vector<8x32xf32>
    %10 = arith.maximumf %7, %9 : vector<8x32xf32>
    %c0_14 = arith.constant 0 : index
    %c2 = arith.constant 2 : index
    %c0_15 = arith.constant 0 : index
    %c0_16 = arith.constant 0 : index
    %11 = vector.load %arg1[%c0_14, %c2, %c0_15, %c0_16] : memref<1x4x8x32xf32, #tpu.memory_space<vmem>>, vector<1x1x8x32xf32>
    %12 = vector.shape_cast %11 : vector<1x1x8x32xf32> to vector<8x32xf32>
    %c0_17 = arith.constant 0 : index
    %c3 = arith.constant 3 : index
    %c0_18 = arith.constant 0 : index
    %c0_19 = arith.constant 0 : index
    %13 = vector.load %arg1[%c0_17, %c3, %c0_18, %c0_19] : memref<1x4x8x32xf32, #tpu.memory_space<vmem>>, vector<1x1x8x32xf32>
    %14 = vector.shape_cast %13 : vector<1x1x8x32xf32> to vector<8x32xf32>
    %15 = arith.maximumf %12, %14 : vector<8x32xf32>
    %16 = arith.maximumf %10, %15 : vector<8x32xf32>
    %c1_20 = arith.constant 1 : index
    %c0_21 = arith.constant 0 : index
    %17 = vector.load %arg7[%c1_20, %c0_21] : memref<10x32xf32, #tpu.memory_space<vmem>>, vector<8x32xf32>
    tpu.vector_store %arg7[%c1_20, %c0_21], %16 {strides = array<i32>} : memref<10x32xf32, #tpu.memory_space<vmem>>, vector<8x32xf32>,
    %c0_22 = arith.constant 0 : index
    %c0_23 = arith.constant 0 : index
    %18 = vector.load %arg7[%c0_22, %c0_23] : memref<10x32xf32, #tpu.memory_space<vmem>>, vector<8x32xf32>
    %19 = arith.truncf %18 : vector<8x32xf32> to vector<8x32xbf16>
    %c0_24 = arith.constant 0 : index
    %c0_25 = arith.constant 0 : index
    %c0_26 = arith.constant 0 : index
    %20 = vector.load %arg2[%c0_24, %c0_25, %c0_26] : memref<3x32x64xbf16, #tpu.memory_space<vmem>>, vector<1x32x64xbf16>
    %21 = vector.shape_cast %20 : vector<1x32x64xbf16> to vector<32x64xbf16>
    %cst_27 = arith.constant dense<0.000000e+00> : vector<8x64xf32>
    %22 = tpu.matmul %19, %21, %cst_27 {dimension_numbers = #tpu.dot_dimension_numbers<[1], [0], [0], [1], [0, 0, 1, 1], [], []>} : vector<8x32xbf16>, vector<32x64xbf16>, vector<8x64xf32> -> vector<8x64xf32>
    %c1_28 = arith.constant 1 : index
    %c0_29 = arith.constant 0 : index
    %23 = vector.load %arg7[%c1_28, %c0_29] : memref<10x32xf32, #tpu.memory_space<vmem>>, vector<8x32xf32>
    %24 = arith.truncf %23 : vector<8x32xf32> to vector<8x32xbf16>
    %c1_30 = arith.constant 1 : index
    %c0_31 = arith.constant 0 : index
    %c0_32 = arith.constant 0 : index
    %25 = vector.load %arg2[%c1_30, %c0_31, %c0_32] : memref<3x32x64xbf16, #tpu.memory_space<vmem>>, vector<1x32x64xbf16>
    %26 = vector.shape_cast %25 : vector<1x32x64xbf16> to vector<32x64xbf16>
    %cst_33 = arith.constant dense<0.000000e+00> : vector<8x64xf32>
    %27 = tpu.matmul %24, %26, %cst_33 {dimension_numbers = #tpu.dot_dimension_numbers<[1], [0], [0], [1], [0, 0, 1, 1], [], []>} : vector<8x32xbf16>, vector<32x64xbf16>, vector<8x64xf32> -> vector<8x64xf32>
    %28 = arith.addf %22, %27 : vector<8x64xf32>
    %c2_34 = arith.constant 2 : index
    %c0_35 = arith.constant 0 : index
    %29 = vector.load %arg7[%c2_34, %c0_35] : memref<10x32xf32, #tpu.memory_space<vmem>>, vector<8x32xf32>
    %30 = arith.truncf %29 : vector<8x32xf32> to vector<8x32xbf16>
    %c2_36 = arith.constant 2 : index
    %c0_37 = arith.constant 0 : index
    %c0_38 = arith.constant 0 : index
    %31 = vector.load %arg2[%c2_36, %c0_37, %c0_38] : memref<3x32x64xbf16, #tpu.memory_space<vmem>>, vector<1x32x64xbf16>
    %32 = vector.shape_cast %31 : vector<1x32x64xbf16> to vector<32x64xbf16>
    %cst_39 = arith.constant dense<0.000000e+00> : vector<8x64xf32>
    %33 = tpu.matmul %30, %32, %cst_39 {dimension_numbers = #tpu.dot_dimension_numbers<[1], [0], [0], [1], [0, 0, 1, 1], [], []>} : vector<8x32xbf16>, vector<32x64xbf16>, vector<8x64xf32> -> vector<8x64xf32>
    %34 = arith.addf %28, %33 : vector<8x64xf32>
    %c0_40 = arith.constant 0 : index
    %c0_41 = arith.constant 0 : index
    %35 = vector.load %arg4[%c0_40, %c0_41] : memref<1x64xf32, #tpu.memory_space<vmem>>, vector<1x64xf32>
    %36 = vector.broadcast %35 : vector<1x64xf32> to vector<8x64xf32>
    %37 = arith.addf %34, %36 : vector<8x64xf32>
    %cst_42 = arith.constant 0.000000e+00 : f32
    %38 = vector.broadcast %cst_42 : f32 to vector<8x64xf32>
    %39 = arith.cmpf oge, %37, %38 : vector<8x64xf32>
    %cst_43 = arith.constant 0.00999999977 : f32
    %40 = vector.broadcast %cst_43 : f32 to vector<8x64xf32>
    %41 = arith.mulf %40, %37 : vector<8x64xf32>
    %42 = arith.select %39, %37, %41 : vector<8x64xi1>, vector<8x64xf32>
    %c1_44 = arith.constant 1 : index
    %c0_45 = arith.constant 0 : index
    %43 = vector.load %arg8[%c1_44, %c0_45] : memref<10x64xf32, #tpu.memory_space<vmem>>, vector<8x64xf32>
    tpu.vector_store %arg8[%c1_44, %c0_45], %42 {strides = array<i32>} : memref<10x64xf32, #tpu.memory_space<vmem>>, vector<8x64xf32>,
    %c0_46 = arith.constant 0 : index
    %c0_47 = arith.constant 0 : index
    %44 = vector.load %arg8[%c0_46, %c0_47] : memref<10x64xf32, #tpu.memory_space<vmem>>, vector<8x64xf32>
    %45 = arith.truncf %44 : vector<8x64xf32> to vector<8x64xbf16>
    %c0_48 = arith.constant 0 : index
    %c0_49 = arith.constant 0 : index
    %c0_50 = arith.constant 0 : index
    %46 = vector.load %arg3[%c0_48, %c0_49, %c0_50] : memref<3x64x64xbf16, #tpu.memory_space<vmem>>, vector<1x64x64xbf16>
    %47 = vector.shape_cast %46 : vector<1x64x64xbf16> to vector<64x64xbf16>
    %cst_51 = arith.constant dense<0.000000e+00> : vector<8x64xf32>
    %48 = tpu.matmul %45, %47, %cst_51 {dimension_numbers = #tpu.dot_dimension_numbers<[1], [0], [0], [1], [0, 0, 1, 1], [], []>} : vector<8x64xbf16>, vector<64x64xbf16>, vector<8x64xf32> -> vector<8x64xf32>
    %c1_52 = arith.constant 1 : index
    %c0_53 = arith.constant 0 : index
    %49 = vector.load %arg8[%c1_52, %c0_53] : memref<10x64xf32, #tpu.memory_space<vmem>>, vector<8x64xf32>
    %50 = arith.truncf %49 : vector<8x64xf32> to vector<8x64xbf16>
    %c1_54 = arith.constant 1 : index
    %c0_55 = arith.constant 0 : index
    %c0_56 = arith.constant 0 : index
    %51 = vector.load %arg3[%c1_54, %c0_55, %c0_56] : memref<3x64x64xbf16, #tpu.memory_space<vmem>>, vector<1x64x64xbf16>
    %52 = vector.shape_cast %51 : vector<1x64x64xbf16> to vector<64x64xbf16>
    %cst_57 = arith.constant dense<0.000000e+00> : vector<8x64xf32>
    %53 = tpu.matmul %50, %52, %cst_57 {dimension_numbers = #tpu.dot_dimension_numbers<[1], [0], [0], [1], [0, 0, 1, 1], [], []>} : vector<8x64xbf16>, vector<64x64xbf16>, vector<8x64xf32> -> vector<8x64xf32>
    %54 = arith.addf %48, %53 : vector<8x64xf32>
    %c2_58 = arith.constant 2 : index
    %c0_59 = arith.constant 0 : index
    %55 = vector.load %arg8[%c2_58, %c0_59] : memref<10x64xf32, #tpu.memory_space<vmem>>, vector<8x64xf32>
    %56 = arith.truncf %55 : vector<8x64xf32> to vector<8x64xbf16>
    %c2_60 = arith.constant 2 : index
    %c0_61 = arith.constant 0 : index
    %c0_62 = arith.constant 0 : index
    %57 = vector.load %arg3[%c2_60, %c0_61, %c0_62] : memref<3x64x64xbf16, #tpu.memory_space<vmem>>, vector<1x64x64xbf16>
    %58 = vector.shape_cast %57 : vector<1x64x64xbf16> to vector<64x64xbf16>
    %cst_63 = arith.constant dense<0.000000e+00> : vector<8x64xf32>
    %59 = tpu.matmul %56, %58, %cst_63 {dimension_numbers = #tpu.dot_dimension_numbers<[1], [0], [0], [1], [0, 0, 1, 1], [], []>} : vector<8x64xbf16>, vector<64x64xbf16>, vector<8x64xf32> -> vector<8x64xf32>
    %60 = arith.addf %54, %59 : vector<8x64xf32>
    %c0_64 = arith.constant 0 : index
    %c0_65 = arith.constant 0 : index
    %61 = vector.load %arg5[%c0_64, %c0_65] : memref<1x64xf32, #tpu.memory_space<vmem>>, vector<1x64xf32>
    %62 = vector.broadcast %61 : vector<1x64xf32> to vector<8x64xf32>
    %63 = arith.addf %60, %62 : vector<8x64xf32>
    %cst_66 = arith.constant 0.000000e+00 : f32
    %64 = vector.broadcast %cst_66 : f32 to vector<8x64xf32>
    %65 = arith.cmpf oge, %63, %64 : vector<8x64xf32>
    %cst_67 = arith.constant 0.00999999977 : f32
    %66 = vector.broadcast %cst_67 : f32 to vector<8x64xf32>
    %67 = arith.mulf %66, %63 : vector<8x64xf32>
    %68 = arith.select %65, %63, %67 : vector<8x64xi1>, vector<8x64xf32>
    %69 = arith.addf %68, %42 : vector<8x64xf32>
    %c0_68 = arith.constant 0 : index
    %c0_69 = arith.constant 0 : index
    %c0_70 = arith.constant 0 : index
    %70 = vector.load %arg6[%c0_68, %c0_69, %c0_70] : memref<1x8x64xf32, #tpu.memory_space<vmem>>, vector<1x8x64xf32>
    %71 = vector.shape_cast %70 : vector<1x8x64xf32> to vector<8x64xf32>
    %72 = vector.shape_cast %69 : vector<8x64xf32> to vector<1x8x64xf32>
    tpu.vector_store %arg6[%c0_68, %c0_69, %c0_70], %72 {strides = array<i32>} : memref<1x8x64xf32, #tpu.memory_space<vmem>>, vector<1x8x64xf32>,
    return
  }
  func.func @transform_0(%arg0: i32) -> (i32, i32, i32, i32) {
    %c0_i32 = arith.constant 0 : i32
    %c0_i32_0 = arith.constant 0 : i32
    %c0_i32_1 = arith.constant 0 : i32
    %c0_i32_2 = arith.constant 0 : i32
    return %arg0, %c0_i32, %c0_i32_0, %c0_i32_1 : i32, i32, i32, i32
  }
  func.func @transform_1(%arg0: i32) -> (i32, i32, i32) {
    %c0_i32 = arith.constant 0 : i32
    %c0_i32_0 = arith.constant 0 : i32
    %c0_i32_1 = arith.constant 0 : i32
    %c0_i32_2 = arith.constant 0 : i32
    return %c0_i32, %c0_i32_0, %c0_i32_1 : i32, i32, i32
  }
  func.func @transform_2(%arg0: i32) -> (i32, i32, i32) {
    %c0_i32 = arith.constant 0 : i32
    %c0_i32_0 = arith.constant 0 : i32
    %c0_i32_1 = arith.constant 0 : i32
    %c0_i32_2 = arith.constant 0 : i32
    return %c0_i32, %c0_i32_0, %c0_i32_1 : i32, i32, i32
  }
  func.func @transform_3(%arg0: i32) -> (i32, i32) {
    %c0_i32 = arith.constant 0 : i32
    %c0_i32_0 = arith.constant 0 : i32
    %c0_i32_1 = arith.constant 0 : i32
    return %c0_i32, %c0_i32_0 : i32, i32
  }
  func.func @transform_4(%arg0: i32) -> (i32, i32) {
    %c0_i32 = arith.constant 0 : i32
    %c0_i32_0 = arith.constant 0 : i32
    %c0_i32_1 = arith.constant 0 : i32
    return %c0_i32, %c0_i32_0 : i32, i32
  }
  func.func @transform_5(%arg0: i32) -> (i32, i32, i32) {
    %c0_i32 = arith.constant 0 : i32
    %c0_i32_0 = arith.constant 0 : i32
    %c0_i32_1 = arith.constant 0 : i32
    return %arg0, %c0_i32, %c0_i32_0 : i32, i32, i32
  }
}

</mosaic_0001>

<bundles_post_ra>
// kernel: down_conv_forward.1
= control target key start
LH: loop header
LB: loop body
LE: loop exit
PB: predicated region body
PF: predicated region fallthrough
CT: control target
= control target key end

     0   :  { %s957_s18 = smov 0   ;;  %s1081_s0 = inlined_call_operand.vmem [shape: f32[2,4,8,32], index: 0, kind: input, shape index: {}]   ;;  %s1082_s1 = inlined_call_operand.vmem [shape: bf16[3,32,64], index: 1, kind: input, shape index: {}]   ;;  %s1083_s2 = inlined_call_operand.vmem [shape: bf16[3,64,64], index: 2, kind: input, shape index: {}]   ;;  %s1084_s3 = inlined_call_operand.vmem [shape: f32[1,64], index: 3, kind: input, shape index: {}]   ;;  %s1085_s4 = inlined_call_operand.vmem [shape: f32[1,64], index: 4, kind: input, shape index: {}]   ;;  %s1086_s5 = inlined_call_operand.vmem [shape: f32[2,8,64], index: 5, kind: output, shape index: {}]  }
   0x1 LB: > { %s741_s19 = sadd.s32 4294967295, %s923_s18   ;;  %p745_p0 = scmp.ge.s32.totalorder %s923_s18, 1  ;;  %s923_s18 = sphi %s957_s18, %s15_s18  }
   0x2   : > { %p187_p1 = scmp.lt.s32.totalorder %s923_s18, 3 }
   0x4   : > { %p188_p2 = pnand %p745_p0, %p187_p1 }
   0x5   : > { %v899_v0 = vld [vmem:[%s1082_s1 + $0x10] sm:$0xff] (!%p188_p2)   ;;  %v925_v1 = vmov (!%p188_p2), 0.0   ;;  %v900_v2 = vld [vmem:[%s1082_s1] sm:$0xff] (!%p188_p2)   ;;  %v901_v3 = vld [vmem:[%s1082_s1 + $0x18] sm:$0xff] (!%p188_p2)   ;;  %vm926_vm0 = vmmov (!%p188_p2), 0   ;;  %p214_p3 = scmp.lt.s32.totalorder (!%p188_p2), %s741_s19, 1 }
   0x6   : > { %191 = sbr.rel (%p188_p2) target bundleno = 507 (0x1fb), region = 40  ;;  %829 = vmatprep.subr.bf16.mxu0 (!%p188_p2), %v925_v1  ;;  %837 = vmatprep.subr.bf16.mxu1 (!%p188_p2), %v925_v1  ;;  %v902_v4 = vld [vmem:[%s1082_s1 + $0x8] sm:$0xff] (!%p188_p2)   ;;  %vm224_vm1 = vcmask (!%p188_p2), 253952   ;;  %vm240_vm2 = vcmask (!%p188_p2), 261120   ;;  %v903_v14 = vld [vmem:[%s1082_s1 + $0x20] sm:$0xff] (!%p188_p2)   ;;  %v909_v24 = vld [vmem:[%s1083_s2 + $0x30] sm:$0xff] (!%p188_p2)  }
   0x7   : > { %830 = vmatpush3.bf16.msra.mxu0 (!%p188_p2), %v899_v0  ;;  %833 = vmatprep.mubr.msk.bf16.mxu0 (!%p188_p2), %vm926_vm0, %v925_v1  ;;  %225 = vst.msk [vmem:[#allocation2] sm:$0x1] (!%p188_p2), %vm224_vm1, %v925_v1  ;;  %226 = vst.msk [vmem:[#allocation2 + $0x9] sm:$0x1] (!%p188_p2), %vm224_vm1, %v925_v1  ;;  %v904_v17 = vld [vmem:[%s1082_s1 + $0x28] sm:$0xff] (!%p188_p2)   ;;  %v905_v20 = vld [vmem:[%s1083_s2 + $0x20] sm:$0xff] (!%p188_p2)  }
   0x8   : > { %838 = vmatpush3.bf16.msra.mxu1 (!%p188_p2), %v900_v2  ;;  %831 = vmatprep.subr.bf16.mxu0 (!%p188_p2), %v925_v1  ;;  %v906_v21 = vld [vmem:[%s1083_s2] sm:$0xff] (!%p188_p2)   ;;  %v907_v22 = vld [vmem:[%s1083_s2 + $0x28] sm:$0xff] (!%p188_p2)   ;;  %v910_v25 = vld [vmem:[%s1083_s2 + $0x10] sm:$0xff] (!%p188_p2)   ;;  %vm227_vm3 = vcmask (!%p188_p2), 516096   ;;  %vm439_vm5 = vcmask (!%p188_p2), 523264  }
   0x9   : > { %839 = vmatprep.subr.bf16.mxu1 (!%p188_p2), %v925_v1  ;;  %841 = vmatprep.mubr.msk.bf16.mxu1 (!%p188_p2), %vm926_vm0, %v925_v1  ;;  %v908_v23 = vld [vmem:[%s1083_s2 + $0x8] sm:$0xff] (!%p188_p2)   ;;  %228 = vst.msk [vmem:[#allocation3] sm:$0x1] (!%p188_p2), %vm227_vm3, %v925_v1  ;;  %229 = vst.msk [vmem:[#allocation3 + $0x9] sm:$0x1] (!%p188_p2), %vm227_vm3, %v925_v1  ;;  %v911_v26 = vld [vmem:[%s1083_s2 + $0x38] sm:$0xff] (!%p188_p2)  }
   0xa   : > { %v912_v27 = vld [vmem:[%s1083_s2 + $0x18] sm:$0xff] (!%p188_p2)   ;;  %v769_v38 = vld [vmem:[%s1084_s3] ss:$0 sm:$0xff] (!%p188_p2)  ;;  %v914_v51 = vld [vmem:[%s1083_s2 + $0x48] sm:$0xff] (!%p188_p2)  }
   0xb   : > { %832 = vmatpush3.bf16.msra.mxu0 (!%p188_p2), %v901_v3  ;;  %v913_v48 = vld [vmem:[%s1083_s2 + $0x40] sm:$0xff] (!%p188_p2)   ;;  %v915_v52 = vld [vmem:[%s1083_s2 + $0x50] sm:$0xff] (!%p188_p2)   ;;  %v916_v53 = vld [vmem:[%s1083_s2 + $0x58] sm:$0xff] (!%p188_p2)  }
   0xc   : > { %840 = vmatpush3.bf16.msra.mxu1 (!%p188_p2), %v902_v4  ;;  %845 = vmatprep.subr.bf16.mxu0 (!%p188_p2), %v925_v1 }
   0xd   : > { %s1088_s19 = smov (!%p214_p3, %s741_s19), 1  ;;  %853 = vmatprep.subr.bf16.mxu1 %v925_v1 }
   0xe   : > { %s804_s28 = sshll.u32 %s1088_s19, 5  ;;  %s748_s16 = sshll.u32 %s1088_s19, 3 }
   0xf   : > { %s218_s6 = scalar_lea.vmem %s1081_s0, %s804_s28  ;;  %s222_s21 = scalar_lea.vmem %s1086_s5, %s748_s16 }
  0x10   : > { %v230_v5 = vld [vmem:[%s218_s6] sm:$0xff]  ;;  %v749_v6 = vld [vmem:[%s218_s6 + $0x8] sm:$0xff]  ;;  %v750_v7 = vld [vmem:[%s218_s6 + $0x10] sm:$0xff] }
  0x11   : > { %v233_v8 = vmax.f32 %v230_v5, %v749_v6  ;;  %v751_v9 = vld [vmem:[%s218_s6 + $0x18] sm:$0xff] }
  0x12   : > { %v238_v10 = vmax.f32 %v750_v7, %v751_v9 }
  0x14   : > { %v239_v11 = vmax.f32 %v233_v8, %v238_v10 }
  0x16   : > { %241 = vst.msk [vmem:[#allocation2 + $0x1] sm:$0xff] %vm240_vm2, %v239_v11 }
  0x1d   : > { %v248_v12 = vld [vmem:[#allocation2 + $0x1] sm:$0xff] }
  0x1e   : > { %v242_v13 = vld [vmem:[#allocation2] sm:$0xff]  ;;  %v249_v15 = vpack.c.bf16 %v248_v12, %v248_v12 }
  0x1f   : > { %v243_v16 = vpack.c.bf16 %v242_v13, %v242_v13  ;;  %v365_v18 = vld [vmem:[#allocation2 + $0x2] sm:$0xff] }
  0x20   : > { %834 = vmatmul.mubr.msk.bf16.vlgmr.msra.gmra.mrb[0].mxu0 %vm240_vm2, %v249_v15  ;;  %v366_v19 = vpack.c.bf16 %v365_v18, %v365_v18 }
  0x21   : > { %842 = vmatmul.mubr.msk.bf16.vlgmr.msra.gmra.mrb[0].mxu1 %vm240_vm2, %v243_v16  ;;  %846 = vmatpush3.bf16.msra.mxu0 %v903_v14 }
  0x22   : > { %849 = vmatprep.mubr.msk.bf16.mxu0 %vm926_vm0, %v925_v1  ;;  %847 = vmatprep.subr.bf16.mxu0 %v925_v1 }
  0x23   : > { %861 = vmatprep.mubr.msk.bf16.mxu1 %vm926_vm0, %v925_v1  ;;  %854 = vmatpush3.bf16.msra.mxu1 %v905_v20 }
  0x24   : > { %855 = vmatprep.subr.bf16.mxu1 %v925_v1 }
  0x25   : > { %848 = vmatpush3.bf16.msra.mxu0 %v904_v17 }
  0x26   : > { %865 = vmatprep.subr.bf16.mxu0 %v925_v1 }
  0x27   : > { %856 = vmatpush3.bf16.msra.mxu1 %v907_v22 }
  0x28   : > { %850 = vmatmul.mubr.msk.bf16.vlgmr.msra.gmra.mrb[4].mxu0 %vm240_vm2, %v366_v19  ;;  %857 = vmatprep.subr.bf16.mxu1 %v925_v1 }
  0x29   : > { %873 = vmatprep.mubr.msk.bf16.mxu0 %vm926_vm0, %v925_v1  ;;  %866 = vmatpush3.bf16.msra.mxu0 %v906_v21 }
  0x2a   : > { %867 = vmatprep.subr.bf16.mxu0 %v925_v1 }
  0x2b   : > { %858 = vmatpush3.bf16.msra.mxu1 %v909_v24 }
  0x2c   : > { %859 = vmatprep.subr.bf16.mxu1 %v925_v1 }
  0x2d   : > { %868 = vmatpush3.bf16.msra.mxu0 %v908_v23 }
  0x2e   : > { %869 = vmatprep.subr.bf16.mxu0 %v925_v1 }
  0x2f   : > { %860 = vmatpush3.bf16.msra.mxu1 %v911_v26 }
  0x30   : > { %877 = vmatprep.subr.bf16.mxu1 %v925_v1 }
  0x31   : > { %870 = vmatpush3.bf16.msra.mxu0 %v910_v25 }
  0x32   : > { %871 = vmatprep.subr.bf16.mxu0 %v925_v1 }
  0x35   : > { %872 = vmatpush3.bf16.msra.mxu0 %v912_v27 }
  0xf3   : > { %v304_v28 = vpop.f32.mrb[0].mxu0 }
  0xf4   : > { %v359_v29 = vpop.f32.mrb[0].mxu1  ;;  %v835_v31 = vpop.f32.mrb[1].mxu0 }
  0xf5   : > { %v360_v30 = vadd.f32 %v359_v29, %v304_v28  ;;  %v843_v32 = vpop.f32.mrb[1].mxu1  ;;  %v307_v33 = vpop.f32.mrb[2].mxu0 }
  0xf6   : > { %v362_v34 = vpop.f32.mrb[2].mxu1  ;;  %v836_v35 = vpop.f32.mrb[3].mxu0 }
  0xf7   : > { %v844_v36 = vpop.f32.mrb[3].mxu1 }
  0xfb   : > { %v421_v37 = vpop.f32.mrb[4].mxu0 }
  0xfc   : > { %v427_v39 = vadd.f32 %v421_v37, %v360_v30  ;;  %v851_v40 = vpop.f32.mrb[5].mxu0 }
  0xfd   : > { %v424_v41 = vpop.f32.mrb[6].mxu0 }
  0xfe   : > { %v435_v42 = vadd.f32 %v769_v38, %v427_v39  ;;  %v852_v43 = vpop.f32.mrb[7].mxu0 }
 0x100   : > { %vm436_vm4 = vcmp.ge.f32.partialorder %v435_v42, 0.0  ;;  %v437_v44 = vmul.f32 0.01, %v435_v42 }
 0x102   : > { %v438_v45 = vsel %vm436_vm4, %v435_v42, %v437_v44 }
 0x103   : > { %440 = vst.msk [vmem:[#allocation3 + $0x1] sm:$0xff] %vm439_vm5, %v438_v45 }
 0x10a   : > { %v451_v46 = vld [vmem:[#allocation3 + $0x1] sm:$0xff] }
 0x10b   : > { %v441_v47 = vld [vmem:[#allocation3] sm:$0xff]  ;;  %v452_v49 = vpack.c.bf16 %v451_v46, %v451_v46 }
 0x10c   : > { %v442_v50 = vpack.c.bf16 %v441_v47, %v441_v47  ;;  %v596_v54 = vld [vmem:[#allocation3 + $0x2] sm:$0xff] }
 0x10d   : > { %862 = vmatmul.mubr.msk.bf16.vlgmr.msra.gmra.mrb[4].mxu1 %vm439_vm5, %v452_v49  ;;  %v597_v55 = vpack.c.bf16 %v596_v54, %v596_v54 }
 0x10e   : > { %874 = vmatmul.mubr.msk.bf16.vlgmr.msra.gmra.mrb[8].mxu0 %vm439_vm5, %v442_v50  ;;  %878 = vmatpush3.bf16.msra.mxu1 %v913_v48 }
 0x10f   : > { %885 = vmatprep.mubr.msk.bf16.mxu1 %vm926_vm0, %v925_v1  ;;  %879 = vmatprep.subr.bf16.mxu1 %v925_v1 }
 0x112   : > { %880 = vmatpush3.bf16.msra.mxu1 %v914_v51 }
 0x113   : > { %881 = vmatprep.subr.bf16.mxu1 %v925_v1 }
 0x116   : > { %882 = vmatpush3.bf16.msra.mxu1 %v915_v52 }
 0x117   : > { %883 = vmatprep.subr.bf16.mxu1 %v925_v1  ;;  %v801_v1 = vld [vmem:[%s1085_s4] ss:$0 sm:$0xff] }
 0x11a   : > { %884 = vmatpush3.bf16.msra.mxu1 %v916_v53 }
 0x11d   : > { %886 = vmatmul.mubr.msk.bf16.vlgmr.msra.gmra.mrb[8].mxu1 %vm439_vm5, %v597_v55 }
 0x1e0   : > { %v523_v56 = vpop.f32.mrb[4].mxu1 }
 0x1e1   : > { %v590_v57 = vpop.f32.mrb[8].mxu0  ;;  %v863_v59 = vpop.f32.mrb[5].mxu1 }
 0x1e2   : > { %v591_v58 = vadd.f32 %v590_v57, %v523_v56  ;;  %v875_v60 = vpop.f32.mrb[9].mxu0  ;;  %v526_v61 = vpop.f32.mrb[6].mxu1 }
 0x1e3   : > { %v593_v62 = vpop.f32.mrb[10].mxu0  ;;  %v864_v63 = vpop.f32.mrb[7].mxu1 }
 0x1e4   : > { %v876_v0 = vpop.f32.mrb[11].mxu0 }
 0x1f0   : > { %v668_v2 = vpop.f32.mrb[8].mxu1 }
 0x1f1   : > { %v674_v3 = vadd.f32 %v668_v2, %v591_v58  ;;  %v887_v4 = vpop.f32.mrb[9].mxu1 }
 0x1f2   : > { %v671_v5 = vpop.f32.mrb[10].mxu1 }
 0x1f3   : > { %v682_v6 = vadd.f32 %v801_v1, %v674_v3  ;;  %v888_v7 = vpop.f32.mrb[11].mxu1 }
 0x1f5   : > { %vm683_vm6 = vcmp.ge.f32.partialorder %v682_v6, 0.0  ;;  %v684_v8 = vmul.f32 0.01, %v682_v6 }
 0x1f7   : > { %v685_v9 = vsel %vm683_vm6, %v682_v6, %v684_v8 }
 0x1f8   : > { %v686_v10 = vadd.f32 %v685_v9, %v438_v45 }
 0x1fa   : > { %687 = vst.msk [vmem:[%s222_s21] sm:$0xff] %vm439_vm5, %v686_v10 }
 0x1fb PF: > { %s15_s18 = sadd.s32 1, %s923_s18  }
 0x1fc   : > { %p12_p4 = scmp.ge.s32.totalorder %s15_s18, 4  }
 0x1fe   :  { %14 = sbr.rel (!%p12_p4) target bundleno = 1 (0x1), region = 77 }

</bundles_post_ra>
